<compile_context>
chip_gen: v7x
topology: tpu7x:2x2x1
jax: 0.10.0
libtpu: 0.0.40
codegen_flags: <defaults>
</compile_context>

<pallas_src>
import functools

import jax
import jax.numpy as jnp
import numpy as np
from jax import lax
from jax.experimental import pallas as pl
from jax.experimental.pallas import tpu as pltpu


def _block_kernel(x_ref, g1_ref, b1_ref, wqkv_ref, wproj_ref, bproj_ref,
                  g2_ref, b2_ref, wfc1_ref, bfc1_ref, wfc2_ref, bfc2_ref,
                  o_ref,
                  qh_ref, kh_ref, vh_ref, attn_ref,
                  *, num_heads, eps):
    N, C = x_ref.shape                       # leading batch dim is squeezed
    H = num_heads
    hd = C // H
    f32 = jnp.float32
    bf16 = jnp.bfloat16

    x = x_ref[...]                           # (N, C) f32

    def layer_norm(v, g, b):
        mu = jnp.mean(v, axis=-1, keepdims=True)
        var = jnp.mean((v - mu) ** 2, axis=-1, keepdims=True)
        return (v - mu) * lax.rsqrt(var + eps) * g + b

    def mm(a, w):                            # bf16 MXU, f32 accumulate
        return jnp.dot(a.astype(bf16), w, preferred_element_type=f32)

    # ---- LayerNorm 1 + fused QKV projection (one wide MXU matmul) ----------
    xn = layer_norm(x, g1_ref[...], b1_ref[...])
    qkv = mm(xn, wqkv_ref[...])              # (N, 3C); Wq pre-scaled by 1/sqrt(hd)

    # ---- head-major relayout into VMEM scratch: (N, 3C) -> 3 x (H, N, hd) ---
    for h in range(H):
        lo, hi = h * hd, (h + 1) * hd
        qh_ref[h] = qkv[:, 0 * C + lo:0 * C + hi].astype(bf16)
        kh_ref[h] = qkv[:, 1 * C + lo:1 * C + hi].astype(bf16)
        vh_ref[h] = qkv[:, 2 * C + lo:2 * C + hi].astype(bf16)

    # ---- attention: heads as a dot_general batch dim ------------------------
    s = jnp.einsum("hnd,hmd->hnm", qh_ref[...], kh_ref[...],
                   preferred_element_type=f32)           # (H, N, N)
    s = s - jnp.max(s, axis=-1, keepdims=True)
    p = jnp.exp(s)
    p = p * pl.reciprocal(jnp.sum(p, axis=-1, keepdims=True), approx=True)
    o_heads = jnp.einsum("hnm,hmd->hnd", p.astype(bf16), vh_ref[...],
                         preferred_element_type=f32)     # (H, N, hd)

    # fold heads back to (N, C) — small static-offset stores, fully overwritten
    for h in range(H):
        attn_ref[:, h * hd:(h + 1) * hd] = o_heads[h]

    attn = mm(attn_ref[...], wproj_ref[...]) + bproj_ref[...]
    x1 = x + attn                                        # residual 1 (f32)

    # ---- LayerNorm 2 + MLP ---------------------------------------------------
    x2 = layer_norm(x1, g2_ref[...], b2_ref[...])
    h1 = mm(x2, wfc1_ref[...]) + bfc1_ref[...]
    h1 = jax.nn.gelu(h1, approximate=True)               # tanh GELU -> EUP
    h2 = mm(h1, wfc2_ref[...]) + bfc2_ref[...]

    o_ref[...] = x1 + h2                                 # residual 2, one lane-dense store


def prepare_params(raw, *, num_heads):
    """One-time weight prep: fold softmax scale into Wq, pre-cast MXU weights
    to bf16 (no per-call .astype in the forward path)."""
    f32, bf16 = jnp.float32, jnp.bfloat16
    C = raw["wproj_t"].shape[0]
    hd = C // num_heads
    scale = hd ** (-0.5)

    wqkv = jnp.asarray(raw["wqkv_t"], f32)               # (C, 3C), cols = [q|k|v]
    wqkv = wqkv.at[:, :C].multiply(scale)                # fold qk scale into Wq
    return dict(
        g1=jnp.asarray(raw["g1"], f32), b1=jnp.asarray(raw["b1"], f32),
        wqkv=wqkv.astype(bf16),
        wproj=jnp.asarray(raw["wproj_t"], bf16), bproj=jnp.asarray(raw["bproj"], f32),
        g2=jnp.asarray(raw["g2"], f32), b2=jnp.asarray(raw["b2"], f32),
        wfc1=jnp.asarray(raw["wfc1_t"], bf16), bfc1=jnp.asarray(raw["bfc1"], f32),
        wfc2=jnp.asarray(raw["wfc2_t"], bf16), bfc2=jnp.asarray(raw["bfc2"], f32),
    )


def block_forward(x, kparams, *, num_heads):
    """x: (B, N, C) float32.  kparams: output of prepare_params."""
    B, N, C = x.shape
    hd = C // num_heads

    weights = [
        kparams["g1"], kparams["b1"], kparams["wqkv"],
        kparams["wproj"], kparams["bproj"],
        kparams["g2"], kparams["b2"],
        kparams["wfc1"], kparams["bfc1"], kparams["wfc2"], kparams["bfc2"],
    ]

    def resident(w):
        # Constant block index across the batch grid -> DMA'd once, reused.
        return pl.BlockSpec(w.shape, lambda b, _nd=w.ndim: (0,) * _nd)

    kernel = functools.partial(_block_kernel, num_heads=num_heads, eps=1e-5)

    act_spec = pl.BlockSpec((None, N, C), lambda b: (b, 0, 0))  # one batch / step

    return pl.pallas_call(
        kernel,
        out_shape=jax.ShapeDtypeStruct((B, N, C), jnp.float32),
        grid=(B,),
        in_specs=[act_spec] + [resident(w) for w in weights],
        out_specs=act_spec,
        scratch_shapes=[
            pltpu.VMEM((num_heads, N, hd), jnp.bfloat16),   # Q, head-major
            pltpu.VMEM((num_heads, N, hd), jnp.bfloat16),   # K
            pltpu.VMEM((num_heads, N, hd), jnp.bfloat16),   # V
            pltpu.VMEM((N, C), jnp.float32),                # head fold-back
        ],
        compiler_params=pltpu.CompilerParams(
            dimension_semantics=("parallel",),          # batch shards across TCs
            vmem_limit_bytes=32 * 1024 * 1024),         # re-derive per generation
    )(x, *weights)


# ---------------------------- pure-JAX reference -----------------------------
def block_reference(x, params, *, num_heads):
    B, N, C = x.shape
    hd = C // num_heads
    scale = hd ** (-0.5)

    def ln(v, g, b):
        mu = jnp.mean(v, axis=-1, keepdims=True)
        var = jnp.mean((v - mu) ** 2, axis=-1, keepdims=True)
        return (v - mu) / jnp.sqrt(var + 1e-5) * g + b

    xn = ln(x, params["g1"], params["b1"])
    qkv = xn @ params["wqkv_t"]                                    # (B, N, 3C)
    qkv = qkv.reshape(B, N, 3, num_heads, hd).transpose(2, 0, 3, 1, 4)
    q, k, v = qkv[0], qkv[1], qkv[2]                               # (B, H, N, hd)
    attn = jnp.einsum("bhnd,bhmd->bhnm", q, k) * scale
    attn = jax.nn.softmax(attn, axis=-1)
    out = jnp.einsum("bhnm,bhmd->bhnd", attn, v)                   # (B, H, N, hd)
    out = out.transpose(0, 2, 1, 3).reshape(B, N, C)
    out = out @ params["wproj_t"] + params["bproj"]
    x1 = x + out

    x2 = ln(x1, params["g2"], params["b2"])
    h = x2 @ params["wfc1_t"] + params["bfc1"]
    h = 0.5 * h * (1.0 + jax.lax.erf(h / jnp.sqrt(2.0)))           # exact GELU
    h = h @ params["wfc2_t"] + params["bfc2"]
    return x1 + h


if __name__ == "__main__":
    # Small shapes consistent with the module: dim=32, heads=4, mlp_hidden=64.
    B, N, C = 2, 8, 32
    num_heads = 4
    HIDDEN = 64

    key = jax.random.PRNGKey(0)
    ks = jax.random.split(key, 12)

    def nrm(k, shape, s=0.02):
        return (s * jax.random.normal(k, shape)).astype(jnp.float32)

    x = jax.random.normal(ks[0], (B, N, C), dtype=jnp.float32)

    # PyTorch Linear weights are (out, in); pre-transpose to (in, out).
    raw_params = {
        "g1": (1.0 + 0.1 * jax.random.normal(ks[1], (1, C))).astype(jnp.float32),
        "b1": nrm(ks[2], (1, C), 0.1),
        "wqkv_t": nrm(ks[3], (3 * C, C)).T,            # qkv_bias=False (default)
        "wproj_t": nrm(ks[4], (C, C)).T,
        "bproj": nrm(ks[5], (1, C), 0.1),
        "g2": (1.0 + 0.1 * jax.random.normal(ks[6], (1, C))).astype(jnp.float32),
        "b2": nrm(ks[7], (1, C), 0.1),
        "wfc1_t": nrm(ks[8], (HIDDEN, C)).T,
        "bfc1": nrm(ks[9], (1, HIDDEN), 0.1),
        "wfc2_t": nrm(ks[10], (C, HIDDEN)).T,
        "bfc2": nrm(ks[11], (1, C), 0.1),
    }

    kparams = prepare_params(raw_params, num_heads=num_heads)

    out = block_forward(x, kparams, num_heads=num_heads)
    out = jax.block_until_ready(out)

    ref = block_reference(x, raw_params, num_heads=num_heads)
    # bf16 MXU operands + approx reciprocal + tanh GELU => relaxed tolerance
    # (known numerics deviation from the exact-erf / exact-div PyTorch Block).
    np.testing.assert_allclose(np.asarray(out), np.asarray(ref),
                               atol=1e-2, rtol=1e-2)

    print("KERNEL_OK")
</pallas_src>

<mosaic_0001>
module attributes {stable_mosaic.version = 11 : i64} {
  func.func @_block_kernel(%arg0: i32, %arg1: memref<1x8x32xf32, #tpu.memory_space<vmem>>, %arg2: memref<1x32xf32, #tpu.memory_space<vmem>>, %arg3: memref<1x32xf32, #tpu.memory_space<vmem>>, %arg4: memref<32x96xbf16, #tpu.memory_space<vmem>>, %arg5: memref<32x32xbf16, #tpu.memory_space<vmem>>, %arg6: memref<1x32xf32, #tpu.memory_space<vmem>>, %arg7: memref<1x32xf32, #tpu.memory_space<vmem>>, %arg8: memref<1x32xf32, #tpu.memory_space<vmem>>, %arg9: memref<32x64xbf16, #tpu.memory_space<vmem>>, %arg10: memref<1x64xf32, #tpu.memory_space<vmem>>, %arg11: memref<64x32xbf16, #tpu.memory_space<vmem>>, %arg12: memref<1x32xf32, #tpu.memory_space<vmem>>, %arg13: memref<1x8x32xf32, #tpu.memory_space<vmem>>, %arg14: memref<4x8x8xbf16, #tpu.memory_space<vmem>>, %arg15: memref<4x8x8xbf16, #tpu.memory_space<vmem>>, %arg16: memref<4x8x8xbf16, #tpu.memory_space<vmem>>, %arg17: memref<8x32xf32, #tpu.memory_space<vmem>>) attributes {dimension_semantics = [#tpu.dimension_semantics<parallel>], iteration_bounds = array<i64: 2>, scalar_prefetch = 0 : i64, scratch_operands = 4 : i64, tpu.core_type = #tpu.core_type<tc>, window_params = [{transform_indices = @transform_0, window_bounds = array<i64: 1, 8, 32>}, {pipeline_mode = #tpu.pipeline_mode<synchronous>, transform_indices = @transform_1, window_bounds = array<i64: 1, 32>}, {pipeline_mode = #tpu.pipeline_mode<synchronous>, transform_indices = @transform_2, window_bounds = array<i64: 1, 32>}, {pipeline_mode = #tpu.pipeline_mode<synchronous>, transform_indices = @transform_3, window_bounds = array<i64: 32, 96>}, {pipeline_mode = #tpu.pipeline_mode<synchronous>, transform_indices = @transform_4, window_bounds = array<i64: 32, 32>}, {pipeline_mode = #tpu.pipeline_mode<synchronous>, transform_indices = @transform_5, window_bounds = array<i64: 1, 32>}, {pipeline_mode = #tpu.pipeline_mode<synchronous>, transform_indices = @transform_6, window_bounds = array<i64: 1, 32>}, {pipeline_mode = #tpu.pipeline_mode<synchronous>, transform_indices = @transform_7, window_bounds = array<i64: 1, 32>}, {pipeline_mode = #tpu.pipeline_mode<synchronous>, transform_indices = @transform_8, window_bounds = array<i64: 32, 64>}, {pipeline_mode = #tpu.pipeline_mode<synchronous>, transform_indices = @transform_9, window_bounds = array<i64: 1, 64>}, {pipeline_mode = #tpu.pipeline_mode<synchronous>, transform_indices = @transform_10, window_bounds = array<i64: 64, 32>}, {pipeline_mode = #tpu.pipeline_mode<synchronous>, transform_indices = @transform_11, window_bounds = array<i64: 1, 32>}, {transform_indices = @transform_12, window_bounds = array<i64: 1, 8, 32>}]} {
    %c0 = arith.constant 0 : index
    %c0_0 = arith.constant 0 : index
    %c0_1 = arith.constant 0 : index
    %0 = vector.load %arg1[%c0, %c0_0, %c0_1] : memref<1x8x32xf32, #tpu.memory_space<vmem>>, vector<1x8x32xf32>
    %1 = vector.shape_cast %0 : vector<1x8x32xf32> to vector<8x32xf32>
    %c0_2 = arith.constant 0 : index
    %c0_3 = arith.constant 0 : index
    %2 = vector.load %arg2[%c0_2, %c0_3] : memref<1x32xf32, #tpu.memory_space<vmem>>, vector<1x32xf32>
    %c0_4 = arith.constant 0 : index
    %c0_5 = arith.constant 0 : index
    %3 = vector.load %arg3[%c0_4, %c0_5] : memref<1x32xf32, #tpu.memory_space<vmem>>, vector<1x32xf32>
    %cst = arith.constant dense<0.000000e+00> : vector<8xf32>
    %4 = vector.multi_reduction <add>, %1, %cst [1] : vector<8x32xf32> to vector<8xf32>
    %5 = vector.shape_cast %4 : vector<8xf32> to vector<8x1xf32>
    %cst_6 = arith.constant 3.200000e+01 : f32
    %6 = vector.broadcast %cst_6 : f32 to vector<8x1xf32>
    %7 = arith.divf %5, %6 : vector<8x1xf32>
    %8 = vector.broadcast %7 : vector<8x1xf32> to vector<8x32xf32>
    %9 = arith.subf %1, %8 : vector<8x32xf32>
    %10 = arith.mulf %9, %9 : vector<8x32xf32>
    %cst_7 = arith.constant dense<0.000000e+00> : vector<8xf32>
    %11 = vector.multi_reduction <add>, %10, %cst_7 [1] : vector<8x32xf32> to vector<8xf32>
    %12 = vector.shape_cast %11 : vector<8xf32> to vector<8x1xf32>
    %cst_8 = arith.constant 3.200000e+01 : f32
    %13 = vector.broadcast %cst_8 : f32 to vector<8x1xf32>
    %14 = arith.divf %12, %13 : vector<8x1xf32>
    %15 = vector.broadcast %7 : vector<8x1xf32> to vector<8x32xf32>
    %16 = arith.subf %1, %15 : vector<8x32xf32>
    %cst_9 = arith.constant 9.99999974E-6 : f32
    %17 = vector.broadcast %cst_9 : f32 to vector<8x1xf32>
    %18 = arith.addf %14, %17 : vector<8x1xf32>
    %19 = math.rsqrt %18 : vector<8x1xf32>
    %20 = vector.broadcast %19 : vector<8x1xf32> to vector<8x32xf32>
    %21 = arith.mulf %16, %20 : vector<8x32xf32>
    %22 = vector.broadcast %2 : vector<1x32xf32> to vector<8x32xf32>
    %23 = arith.mulf %21, %22 : vector<8x32xf32>
    %24 = vector.broadcast %3 : vector<1x32xf32> to vector<8x32xf32>
    %25 = arith.addf %23, %24 : vector<8x32xf32>
    %c0_10 = arith.constant 0 : index
    %c0_11 = arith.constant 0 : index
    %26 = vector.load %arg4[%c0_10, %c0_11] : memref<32x96xbf16, #tpu.memory_space<vmem>>, vector<32x96xbf16>
    %27 = arith.truncf %25 : vector<8x32xf32> to vector<8x32xbf16>
    %cst_12 = arith.constant dense<0.000000e+00> : vector<8x96xf32>
    %28 = tpu.matmul %27, %26, %cst_12 {dimension_numbers = #tpu.dot_dimension_numbers<[1], [0], [0], [1], [0, 0, 1, 1], [], []>} : vector<8x32xbf16>, vector<32x96xbf16>, vector<8x96xf32> -> vector<8x96xf32>
    %29 = vector.extract_strided_slice %28 {offsets = [0, 0], sizes = [8, 8], strides = [1, 1]} : vector<8x96xf32> to vector<8x8xf32>
    %30 = arith.truncf %29 : vector<8x8xf32> to vector<8x8xbf16>
    %c0_13 = arith.constant 0 : index
    %c0_14 = arith.constant 0 : index
    %c0_15 = arith.constant 0 : index
    %31 = vector.load %arg14[%c0_13, %c0_14, %c0_15] : memref<4x8x8xbf16, #tpu.memory_space<vmem>>, vector<1x8x8xbf16>
    %32 = vector.shape_cast %31 : vector<1x8x8xbf16> to vector<8x8xbf16>
    %33 = vector.shape_cast %30 : vector<8x8xbf16> to vector<1x8x8xbf16>
    tpu.vector_store %arg14[%c0_13, %c0_14, %c0_15], %33 {strides = array<i32>} : memref<4x8x8xbf16, #tpu.memory_space<vmem>>, vector<1x8x8xbf16>,
    %34 = vector.extract_strided_slice %28 {offsets = [0, 32], sizes = [8, 8], strides = [1, 1]} : vector<8x96xf32> to vector<8x8xf32>
    %35 = arith.truncf %34 : vector<8x8xf32> to vector<8x8xbf16>
    %c0_16 = arith.constant 0 : index
    %c0_17 = arith.constant 0 : index
    %c0_18 = arith.constant 0 : index
    %36 = vector.load %arg15[%c0_16, %c0_17, %c0_18] : memref<4x8x8xbf16, #tpu.memory_space<vmem>>, vector<1x8x8xbf16>
    %37 = vector.shape_cast %36 : vector<1x8x8xbf16> to vector<8x8xbf16>
    %38 = vector.shape_cast %35 : vector<8x8xbf16> to vector<1x8x8xbf16>
    tpu.vector_store %arg15[%c0_16, %c0_17, %c0_18], %38 {strides = array<i32>} : memref<4x8x8xbf16, #tpu.memory_space<vmem>>, vector<1x8x8xbf16>,
    %39 = vector.extract_strided_slice %28 {offsets = [0, 64], sizes = [8, 8], strides = [1, 1]} : vector<8x96xf32> to vector<8x8xf32>
    %40 = arith.truncf %39 : vector<8x8xf32> to vector<8x8xbf16>
    %c0_19 = arith.constant 0 : index
    %c0_20 = arith.constant 0 : index
    %c0_21 = arith.constant 0 : index
    %41 = vector.load %arg16[%c0_19, %c0_20, %c0_21] : memref<4x8x8xbf16, #tpu.memory_space<vmem>>, vector<1x8x8xbf16>
    %42 = vector.shape_cast %41 : vector<1x8x8xbf16> to vector<8x8xbf16>
    %43 = vector.shape_cast %40 : vector<8x8xbf16> to vector<1x8x8xbf16>
    tpu.vector_store %arg16[%c0_19, %c0_20, %c0_21], %43 {strides = array<i32>} : memref<4x8x8xbf16, #tpu.memory_space<vmem>>, vector<1x8x8xbf16>,
    %44 = vector.extract_strided_slice %28 {offsets = [0, 8], sizes = [8, 8], strides = [1, 1]} : vector<8x96xf32> to vector<8x8xf32>
    %45 = arith.truncf %44 : vector<8x8xf32> to vector<8x8xbf16>
    %c1 = arith.constant 1 : index
    %c0_22 = arith.constant 0 : index
    %c0_23 = arith.constant 0 : index
    %46 = vector.load %arg14[%c1, %c0_22, %c0_23] : memref<4x8x8xbf16, #tpu.memory_space<vmem>>, vector<1x8x8xbf16>
    %47 = vector.shape_cast %46 : vector<1x8x8xbf16> to vector<8x8xbf16>
    %48 = vector.shape_cast %45 : vector<8x8xbf16> to vector<1x8x8xbf16>
    tpu.vector_store %arg14[%c1, %c0_22, %c0_23], %48 {strides = array<i32>} : memref<4x8x8xbf16, #tpu.memory_space<vmem>>, vector<1x8x8xbf16>,
    %49 = vector.extract_strided_slice %28 {offsets = [0, 40], sizes = [8, 8], strides = [1, 1]} : vector<8x96xf32> to vector<8x8xf32>
    %50 = arith.truncf %49 : vector<8x8xf32> to vector<8x8xbf16>
    %c1_24 = arith.constant 1 : index
    %c0_25 = arith.constant 0 : index
    %c0_26 = arith.constant 0 : index
    %51 = vector.load %arg15[%c1_24, %c0_25, %c0_26] : memref<4x8x8xbf16, #tpu.memory_space<vmem>>, vector<1x8x8xbf16>
    %52 = vector.shape_cast %51 : vector<1x8x8xbf16> to vector<8x8xbf16>
    %53 = vector.shape_cast %50 : vector<8x8xbf16> to vector<1x8x8xbf16>
    tpu.vector_store %arg15[%c1_24, %c0_25, %c0_26], %53 {strides = array<i32>} : memref<4x8x8xbf16, #tpu.memory_space<vmem>>, vector<1x8x8xbf16>,
    %54 = vector.extract_strided_slice %28 {offsets = [0, 72], sizes = [8, 8], strides = [1, 1]} : vector<8x96xf32> to vector<8x8xf32>
    %55 = arith.truncf %54 : vector<8x8xf32> to vector<8x8xbf16>
    %c1_27 = arith.constant 1 : index
    %c0_28 = arith.constant 0 : index
    %c0_29 = arith.constant 0 : index
    %56 = vector.load %arg16[%c1_27, %c0_28, %c0_29] : memref<4x8x8xbf16, #tpu.memory_space<vmem>>, vector<1x8x8xbf16>
    %57 = vector.shape_cast %56 : vector<1x8x8xbf16> to vector<8x8xbf16>
    %58 = vector.shape_cast %55 : vector<8x8xbf16> to vector<1x8x8xbf16>
    tpu.vector_store %arg16[%c1_27, %c0_28, %c0_29], %58 {strides = array<i32>} : memref<4x8x8xbf16, #tpu.memory_space<vmem>>, vector<1x8x8xbf16>,
    %59 = vector.extract_strided_slice %28 {offsets = [0, 16], sizes = [8, 8], strides = [1, 1]} : vector<8x96xf32> to vector<8x8xf32>
    %60 = arith.truncf %59 : vector<8x8xf32> to vector<8x8xbf16>
    %c2 = arith.constant 2 : index
    %c0_30 = arith.constant 0 : index
    %c0_31 = arith.constant 0 : index
    %61 = vector.load %arg14[%c2, %c0_30, %c0_31] : memref<4x8x8xbf16, #tpu.memory_space<vmem>>, vector<1x8x8xbf16>
    %62 = vector.shape_cast %61 : vector<1x8x8xbf16> to vector<8x8xbf16>
    %63 = vector.shape_cast %60 : vector<8x8xbf16> to vector<1x8x8xbf16>
    tpu.vector_store %arg14[%c2, %c0_30, %c0_31], %63 {strides = array<i32>} : memref<4x8x8xbf16, #tpu.memory_space<vmem>>, vector<1x8x8xbf16>,
    %64 = vector.extract_strided_slice %28 {offsets = [0, 48], sizes = [8, 8], strides = [1, 1]} : vector<8x96xf32> to vector<8x8xf32>
    %65 = arith.truncf %64 : vector<8x8xf32> to vector<8x8xbf16>
    %c2_32 = arith.constant 2 : index
    %c0_33 = arith.constant 0 : index
    %c0_34 = arith.constant 0 : index
    %66 = vector.load %arg15[%c2_32, %c0_33, %c0_34] : memref<4x8x8xbf16, #tpu.memory_space<vmem>>, vector<1x8x8xbf16>
    %67 = vector.shape_cast %66 : vector<1x8x8xbf16> to vector<8x8xbf16>
    %68 = vector.shape_cast %65 : vector<8x8xbf16> to vector<1x8x8xbf16>
    tpu.vector_store %arg15[%c2_32, %c0_33, %c0_34], %68 {strides = array<i32>} : memref<4x8x8xbf16, #tpu.memory_space<vmem>>, vector<1x8x8xbf16>,
    %69 = vector.extract_strided_slice %28 {offsets = [0, 80], sizes = [8, 8], strides = [1, 1]} : vector<8x96xf32> to vector<8x8xf32>
    %70 = arith.truncf %69 : vector<8x8xf32> to vector<8x8xbf16>
    %c2_35 = arith.constant 2 : index
    %c0_36 = arith.constant 0 : index
    %c0_37 = arith.constant 0 : index
    %71 = vector.load %arg16[%c2_35, %c0_36, %c0_37] : memref<4x8x8xbf16, #tpu.memory_space<vmem>>, vector<1x8x8xbf16>
    %72 = vector.shape_cast %71 : vector<1x8x8xbf16> to vector<8x8xbf16>
    %73 = vector.shape_cast %70 : vector<8x8xbf16> to vector<1x8x8xbf16>
    tpu.vector_store %arg16[%c2_35, %c0_36, %c0_37], %73 {strides = array<i32>} : memref<4x8x8xbf16, #tpu.memory_space<vmem>>, vector<1x8x8xbf16>,
    %74 = vector.extract_strided_slice %28 {offsets = [0, 24], sizes = [8, 8], strides = [1, 1]} : vector<8x96xf32> to vector<8x8xf32>
    %75 = arith.truncf %74 : vector<8x8xf32> to vector<8x8xbf16>
    %c3 = arith.constant 3 : index
    %c0_38 = arith.constant 0 : index
    %c0_39 = arith.constant 0 : index
    %76 = vector.load %arg14[%c3, %c0_38, %c0_39] : memref<4x8x8xbf16, #tpu.memory_space<vmem>>, vector<1x8x8xbf16>
    %77 = vector.shape_cast %76 : vector<1x8x8xbf16> to vector<8x8xbf16>
    %78 = vector.shape_cast %75 : vector<8x8xbf16> to vector<1x8x8xbf16>
    tpu.vector_store %arg14[%c3, %c0_38, %c0_39], %78 {strides = array<i32>} : memref<4x8x8xbf16, #tpu.memory_space<vmem>>, vector<1x8x8xbf16>,
    %79 = vector.extract_strided_slice %28 {offsets = [0, 56], sizes = [8, 8], strides = [1, 1]} : vector<8x96xf32> to vector<8x8xf32>
    %80 = arith.truncf %79 : vector<8x8xf32> to vector<8x8xbf16>
    %c3_40 = arith.constant 3 : index
    %c0_41 = arith.constant 0 : index
    %c0_42 = arith.constant 0 : index
    %81 = vector.load %arg15[%c3_40, %c0_41, %c0_42] : memref<4x8x8xbf16, #tpu.memory_space<vmem>>, vector<1x8x8xbf16>
    %82 = vector.shape_cast %81 : vector<1x8x8xbf16> to vector<8x8xbf16>
    %83 = vector.shape_cast %80 : vector<8x8xbf16> to vector<1x8x8xbf16>
    tpu.vector_store %arg15[%c3_40, %c0_41, %c0_42], %83 {strides = array<i32>} : memref<4x8x8xbf16, #tpu.memory_space<vmem>>, vector<1x8x8xbf16>,
    %84 = vector.extract_strided_slice %28 {offsets = [0, 88], sizes = [8, 8], strides = [1, 1]} : vector<8x96xf32> to vector<8x8xf32>
    %85 = arith.truncf %84 : vector<8x8xf32> to vector<8x8xbf16>
    %c3_43 = arith.constant 3 : index
    %c0_44 = arith.constant 0 : index
    %c0_45 = arith.constant 0 : index
    %86 = vector.load %arg16[%c3_43, %c0_44, %c0_45] : memref<4x8x8xbf16, #tpu.memory_space<vmem>>, vector<1x8x8xbf16>
    %87 = vector.shape_cast %86 : vector<1x8x8xbf16> to vector<8x8xbf16>
    %88 = vector.shape_cast %85 : vector<8x8xbf16> to vector<1x8x8xbf16>
    tpu.vector_store %arg16[%c3_43, %c0_44, %c0_45], %88 {strides = array<i32>} : memref<4x8x8xbf16, #tpu.memory_space<vmem>>, vector<1x8x8xbf16>,
    %c0_46 = arith.constant 0 : index
    %c0_47 = arith.constant 0 : index
    %c0_48 = arith.constant 0 : index
    %89 = vector.load %arg14[%c0_46, %c0_47, %c0_48] : memref<4x8x8xbf16, #tpu.memory_space<vmem>>, vector<4x8x8xbf16>
    %c0_49 = arith.constant 0 : index
    %c0_50 = arith.constant 0 : index
    %c0_51 = arith.constant 0 : index
    %90 = vector.load %arg15[%c0_49, %c0_50, %c0_51] : memref<4x8x8xbf16, #tpu.memory_space<vmem>>, vector<4x8x8xbf16>
    "tpu.trace_start"() <{level = 10 : i32, message = "hnd,hmd->hnm"}> : () -> ()
    %cst_52 = arith.constant dense<0.000000e+00> : vector<4x8x8xf32>
    %91 = tpu.matmul %89, %90, %cst_52 {dimension_numbers = #tpu.dot_dimension_numbers<[2], [2], [1], [1], [0, 0, 0, 1, 1, 1], [0], [0]>} : vector<4x8x8xbf16>, vector<4x8x8xbf16>, vector<4x8x8xf32> -> vector<4x8x8xf32>
    "tpu.trace_stop"() : () -> ()
    %cst_53 = arith.constant dense<0xFF800000> : vector<4x8xf32>
    %92 = vector.multi_reduction <maximumf>, %91, %cst_53 [2] : vector<4x8x8xf32> to vector<4x8xf32>
    %93 = vector.shape_cast %92 : vector<4x8xf32> to vector<4x8x1xf32>
    %94 = vector.broadcast %93 : vector<4x8x1xf32> to vector<4x8x8xf32>
    %95 = arith.subf %91, %94 : vector<4x8x8xf32>
    %96 = math.exp %95 : vector<4x8x8xf32>
    %cst_54 = arith.constant dense<0.000000e+00> : vector<4x8xf32>
    %97 = vector.multi_reduction <add>, %96, %cst_54 [2] : vector<4x8x8xf32> to vector<4x8xf32>
    %98 = vector.shape_cast %97 : vector<4x8xf32> to vector<4x8x1xf32>
    %99 = tpu.reciprocal %98 {approx = true} : vector<4x8x1xf32> -> vector<4x8x1xf32>
    %100 = vector.broadcast %99 : vector<4x8x1xf32> to vector<4x8x8xf32>
    %101 = arith.mulf %96, %100 : vector<4x8x8xf32>
    %102 = arith.truncf %101 : vector<4x8x8xf32> to vector<4x8x8xbf16>
    %c0_55 = arith.constant 0 : index
    %c0_56 = arith.constant 0 : index
    %c0_57 = arith.constant 0 : index
    %103 = vector.load %arg16[%c0_55, %c0_56, %c0_57] : memref<4x8x8xbf16, #tpu.memory_space<vmem>>, vector<4x8x8xbf16>
    "tpu.trace_start"() <{level = 10 : i32, message = "hnm,hmd->hnd"}> : () -> ()
    %cst_58 = arith.constant dense<0.000000e+00> : vector<4x8x8xf32>
    %104 = tpu.matmul %102, %103, %cst_58 {dimension_numbers = #tpu.dot_dimension_numbers<[2], [1], [1], [2], [0, 0, 0, 1, 1, 2], [0], [0]>} : vector<4x8x8xbf16>, vector<4x8x8xbf16>, vector<4x8x8xf32> -> vector<4x8x8xf32>
    "tpu.trace_stop"() : () -> ()
    %105 = vector.extract_strided_slice %104 {offsets = [0, 0, 0], sizes = [1, 8, 8], strides = [1, 1, 1]} : vector<4x8x8xf32> to vector<1x8x8xf32>
    %106 = vector.shape_cast %105 : vector<1x8x8xf32> to vector<8x8xf32>
    %c0_59 = arith.constant 0 : index
    %c0_60 = arith.constant 0 : index
    %107 = vector.load %arg17[%c0_59, %c0_60] : memref<8x32xf32, #tpu.memory_space<vmem>>, vector<8x8xf32>
    tpu.vector_store %arg17[%c0_59, %c0_60], %106 {strides = array<i32>} : memref<8x32xf32, #tpu.memory_space<vmem>>, vector<8x8xf32>,
    %108 = vector.extract_strided_slice %104 {offsets = [1, 0, 0], sizes = [1, 8, 8], strides = [1, 1, 1]} : vector<4x8x8xf32> to vector<1x8x8xf32>
    %109 = vector.shape_cast %108 : vector<1x8x8xf32> to vector<8x8xf32>
    %c0_61 = arith.constant 0 : index
    %c8 = arith.constant 8 : index
    %110 = vector.load %arg17[%c0_61, %c8] : memref<8x32xf32, #tpu.memory_space<vmem>>, vector<8x8xf32>
    tpu.vector_store %arg17[%c0_61, %c8], %109 {strides = array<i32>} : memref<8x32xf32, #tpu.memory_space<vmem>>, vector<8x8xf32>,
    %111 = vector.extract_strided_slice %104 {offsets = [2, 0, 0], sizes = [1, 8, 8], strides = [1, 1, 1]} : vector<4x8x8xf32> to vector<1x8x8xf32>
    %112 = vector.shape_cast %111 : vector<1x8x8xf32> to vector<8x8xf32>
    %c0_62 = arith.constant 0 : index
    %c16 = arith.constant 16 : index
    %113 = vector.load %arg17[%c0_62, %c16] : memref<8x32xf32, #tpu.memory_space<vmem>>, vector<8x8xf32>
    tpu.vector_store %arg17[%c0_62, %c16], %112 {strides = array<i32>} : memref<8x32xf32, #tpu.memory_space<vmem>>, vector<8x8xf32>,
    %114 = vector.extract_strided_slice %104 {offsets = [3, 0, 0], sizes = [1, 8, 8], strides = [1, 1, 1]} : vector<4x8x8xf32> to vector<1x8x8xf32>
    %115 = vector.shape_cast %114 : vector<1x8x8xf32> to vector<8x8xf32>
    %c0_63 = arith.constant 0 : index
    %c24 = arith.constant 24 : index
    %116 = vector.load %arg17[%c0_63, %c24] : memref<8x32xf32, #tpu.memory_space<vmem>>, vector<8x8xf32>
    tpu.vector_store %arg17[%c0_63, %c24], %115 {strides = array<i32>} : memref<8x32xf32, #tpu.memory_space<vmem>>, vector<8x8xf32>,
    %c0_64 = arith.constant 0 : index
    %c0_65 = arith.constant 0 : index
    %117 = vector.load %arg17[%c0_64, %c0_65] : memref<8x32xf32, #tpu.memory_space<vmem>>, vector<8x32xf32>
    %c0_66 = arith.constant 0 : index
    %c0_67 = arith.constant 0 : index
    %118 = vector.load %arg5[%c0_66, %c0_67] : memref<32x32xbf16, #tpu.memory_space<vmem>>, vector<32x32xbf16>
    %119 = arith.truncf %117 : vector<8x32xf32> to vector<8x32xbf16>
    %cst_68 = arith.constant dense<0.000000e+00> : vector<8x32xf32>
    %120 = tpu.matmul %119, %118, %cst_68 {dimension_numbers = #tpu.dot_dimension_numbers<[1], [0], [0], [1], [0, 0, 1, 1], [], []>} : vector<8x32xbf16>, vector<32x32xbf16>, vector<8x32xf32> -> vector<8x32xf32>
    %c0_69 = arith.constant 0 : index
    %c0_70 = arith.constant 0 : index
    %121 = vector.load %arg6[%c0_69, %c0_70] : memref<1x32xf32, #tpu.memory_space<vmem>>, vector<1x32xf32>
    %122 = vector.broadcast %121 : vector<1x32xf32> to vector<8x32xf32>
    %123 = arith.addf %120, %122 : vector<8x32xf32>
    %124 = arith.addf %1, %123 : vector<8x32xf32>
    %c0_71 = arith.constant 0 : index
    %c0_72 = arith.constant 0 : index
    %125 = vector.load %arg7[%c0_71, %c0_72] : memref<1x32xf32, #tpu.memory_space<vmem>>, vector<1x32xf32>
    %c0_73 = arith.constant 0 : index
    %c0_74 = arith.constant 0 : index
    %126 = vector.load %arg8[%c0_73, %c0_74] : memref<1x32xf32, #tpu.memory_space<vmem>>, vector<1x32xf32>
    %cst_75 = arith.constant dense<0.000000e+00> : vector<8xf32>
    %127 = vector.multi_reduction <add>, %124, %cst_75 [1] : vector<8x32xf32> to vector<8xf32>
    %128 = vector.shape_cast %127 : vector<8xf32> to vector<8x1xf32>
    %cst_76 = arith.constant 3.200000e+01 : f32
    %129 = vector.broadcast %cst_76 : f32 to vector<8x1xf32>
    %130 = arith.divf %128, %129 : vector<8x1xf32>
    %131 = vector.broadcast %130 : vector<8x1xf32> to vector<8x32xf32>
    %132 = arith.subf %124, %131 : vector<8x32xf32>
    %133 = arith.mulf %132, %132 : vector<8x32xf32>
    %cst_77 = arith.constant dense<0.000000e+00> : vector<8xf32>
    %134 = vector.multi_reduction <add>, %133, %cst_77 [1] : vector<8x32xf32> to vector<8xf32>
    %135 = vector.shape_cast %134 : vector<8xf32> to vector<8x1xf32>
    %cst_78 = arith.constant 3.200000e+01 : f32
    %136 = vector.broadcast %cst_78 : f32 to vector<8x1xf32>
    %137 = arith.divf %135, %136 : vector<8x1xf32>
    %138 = vector.broadcast %130 : vector<8x1xf32> to vector<8x32xf32>
    %139 = arith.subf %124, %138 : vector<8x32xf32>
    %cst_79 = arith.constant 9.99999974E-6 : f32
    %140 = vector.broadcast %cst_79 : f32 to vector<8x1xf32>
    %141 = arith.addf %137, %140 : vector<8x1xf32>
    %142 = math.rsqrt %141 : vector<8x1xf32>
    %143 = vector.broadcast %142 : vector<8x1xf32> to vector<8x32xf32>
    %144 = arith.mulf %139, %143 : vector<8x32xf32>
    %145 = vector.broadcast %125 : vector<1x32xf32> to vector<8x32xf32>
    %146 = arith.mulf %144, %145 : vector<8x32xf32>
    %147 = vector.broadcast %126 : vector<1x32xf32> to vector<8x32xf32>
    %148 = arith.addf %146, %147 : vector<8x32xf32>
    %c0_80 = arith.constant 0 : index
    %c0_81 = arith.constant 0 : index
    %149 = vector.load %arg9[%c0_80, %c0_81] : memref<32x64xbf16, #tpu.memory_space<vmem>>, vector<32x64xbf16>
    %150 = arith.truncf %148 : vector<8x32xf32> to vector<8x32xbf16>
    %cst_82 = arith.constant dense<0.000000e+00> : vector<8x64xf32>
    %151 = tpu.matmul %150, %149, %cst_82 {dimension_numbers = #tpu.dot_dimension_numbers<[1], [0], [0], [1], [0, 0, 1, 1], [], []>} : vector<8x32xbf16>, vector<32x64xbf16>, vector<8x64xf32> -> vector<8x64xf32>
    %c0_83 = arith.constant 0 : index
    %c0_84 = arith.constant 0 : index
    %152 = vector.load %arg10[%c0_83, %c0_84] : memref<1x64xf32, #tpu.memory_space<vmem>>, vector<1x64xf32>
    %153 = vector.broadcast %152 : vector<1x64xf32> to vector<8x64xf32>
    %154 = arith.addf %151, %153 : vector<8x64xf32>
    %155 = arith.mulf %154, %154 : vector<8x64xf32>
    %156 = arith.mulf %154, %155 : vector<8x64xf32>
    %cst_85 = arith.constant 4.471500e-02 : f32
    %157 = vector.broadcast %cst_85 : f32 to vector<8x64xf32>
    %158 = arith.mulf %157, %156 : vector<8x64xf32>
    %159 = arith.addf %154, %158 : vector<8x64xf32>
    %cst_86 = arith.constant 0.797884583 : f32
    %160 = vector.broadcast %cst_86 : f32 to vector<8x64xf32>
    %161 = arith.mulf %160, %159 : vector<8x64xf32>
    %162 = math.tanh %161 : vector<8x64xf32>
    %cst_87 = arith.constant 1.000000e+00 : f32
    %163 = vector.broadcast %cst_87 : f32 to vector<8x64xf32>
    %164 = arith.addf %163, %162 : vector<8x64xf32>
    %cst_88 = arith.constant 5.000000e-01 : f32
    %165 = vector.broadcast %cst_88 : f32 to vector<8x64xf32>
    %166 = arith.mulf %165, %164 : vector<8x64xf32>
    %167 = arith.mulf %154, %166 : vector<8x64xf32>
    %c0_89 = arith.constant 0 : index
    %c0_90 = arith.constant 0 : index
    %168 = vector.load %arg11[%c0_89, %c0_90] : memref<64x32xbf16, #tpu.memory_space<vmem>>, vector<64x32xbf16>
    %169 = arith.truncf %167 : vector<8x64xf32> to vector<8x64xbf16>
    %cst_91 = arith.constant dense<0.000000e+00> : vector<8x32xf32>
    %170 = tpu.matmul %169, %168, %cst_91 {dimension_numbers = #tpu.dot_dimension_numbers<[1], [0], [0], [1], [0, 0, 1, 1], [], []>} : vector<8x64xbf16>, vector<64x32xbf16>, vector<8x32xf32> -> vector<8x32xf32>
    %c0_92 = arith.constant 0 : index
    %c0_93 = arith.constant 0 : index
    %171 = vector.load %arg12[%c0_92, %c0_93] : memref<1x32xf32, #tpu.memory_space<vmem>>, vector<1x32xf32>
    %172 = vector.broadcast %171 : vector<1x32xf32> to vector<8x32xf32>
    %173 = arith.addf %170, %172 : vector<8x32xf32>
    %174 = arith.addf %124, %173 : vector<8x32xf32>
    %c0_94 = arith.constant 0 : index
    %c0_95 = arith.constant 0 : index
    %c0_96 = arith.constant 0 : index
    %175 = vector.load %arg13[%c0_94, %c0_95, %c0_96] : memref<1x8x32xf32, #tpu.memory_space<vmem>>, vector<1x8x32xf32>
    %176 = vector.shape_cast %175 : vector<1x8x32xf32> to vector<8x32xf32>
    %177 = vector.shape_cast %174 : vector<8x32xf32> to vector<1x8x32xf32>
    tpu.vector_store %arg13[%c0_94, %c0_95, %c0_96], %177 {strides = array<i32>} : memref<1x8x32xf32, #tpu.memory_space<vmem>>, vector<1x8x32xf32>,
    return
  }
  func.func @transform_0(%arg0: i32) -> (i32, i32, i32) {
    %c0_i32 = arith.constant 0 : i32
    %c0_i32_0 = arith.constant 0 : i32
    %c0_i32_1 = arith.constant 0 : i32
    return %arg0, %c0_i32, %c0_i32_0 : i32, i32, i32
  }
  func.func @transform_1(%arg0: i32) -> (i32, i32) {
    %c0_i32 = arith.constant 0 : i32
    %c0_i32_0 = arith.constant 0 : i32
    %c0_i32_1 = arith.constant 0 : i32
    return %c0_i32, %c0_i32_0 : i32, i32
  }
  func.func @transform_2(%arg0: i32) -> (i32, i32) {
    %c0_i32 = arith.constant 0 : i32
    %c0_i32_0 = arith.constant 0 : i32
    %c0_i32_1 = arith.constant 0 : i32
    return %c0_i32, %c0_i32_0 : i32, i32
  }
  func.func @transform_3(%arg0: i32) -> (i32, i32) {
    %c0_i32 = arith.constant 0 : i32
    %c0_i32_0 = arith.constant 0 : i32
    %c0_i32_1 = arith.constant 0 : i32
    return %c0_i32, %c0_i32_0 : i32, i32
  }
  func.func @transform_4(%arg0: i32) -> (i32, i32) {
    %c0_i32 = arith.constant 0 : i32
    %c0_i32_0 = arith.constant 0 : i32
    %c0_i32_1 = arith.constant 0 : i32
    return %c0_i32, %c0_i32_0 : i32, i32
  }
  func.func @transform_5(%arg0: i32) -> (i32, i32) {
    %c0_i32 = arith.constant 0 : i32
    %c0_i32_0 = arith.constant 0 : i32
    %c0_i32_1 = arith.constant 0 : i32
    return %c0_i32, %c0_i32_0 : i32, i32
  }
  func.func @transform_6(%arg0: i32) -> (i32, i32) {
    %c0_i32 = arith.constant 0 : i32
    %c0_i32_0 = arith.constant 0 : i32
    %c0_i32_1 = arith.constant 0 : i32
    return %c0_i32, %c0_i32_0 : i32, i32
  }
  func.func @transform_7(%arg0: i32) -> (i32, i32) {
    %c0_i32 = arith.constant 0 : i32
    %c0_i32_0 = arith.constant 0 : i32
    %c0_i32_1 = arith.constant 0 : i32
    return %c0_i32, %c0_i32_0 : i32, i32
  }
  func.func @transform_8(%arg0: i32) -> (i32, i32) {
    %c0_i32 = arith.constant 0 : i32
    %c0_i32_0 = arith.constant 0 : i32
    %c0_i32_1 = arith.constant 0 : i32
    return %c0_i32, %c0_i32_0 : i32, i32
  }
  func.func @transform_9(%arg0: i32) -> (i32, i32) {
    %c0_i32 = arith.constant 0 : i32
    %c0_i32_0 = arith.constant 0 : i32
    %c0_i32_1 = arith.constant 0 : i32
    return %c0_i32, %c0_i32_0 : i32, i32
  }
  func.func @transform_10(%arg0: i32) -> (i32, i32) {
    %c0_i32 = arith.constant 0 : i32
    %c0_i32_0 = arith.constant 0 : i32
    %c0_i32_1 = arith.constant 0 : i32
    return %c0_i32, %c0_i32_0 : i32, i32
  }
  func.func @transform_11(%arg0: i32) -> (i32, i32) {
    %c0_i32 = arith.constant 0 : i32
    %c0_i32_0 = arith.constant 0 : i32
    %c0_i32_1 = arith.constant 0 : i32
    return %c0_i32, %c0_i32_0 : i32, i32
  }
  func.func @transform_12(%arg0: i32) -> (i32, i32, i32) {
    %c0_i32 = arith.constant 0 : i32
    %c0_i32_0 = arith.constant 0 : i32
    %c0_i32_1 = arith.constant 0 : i32
    return %arg0, %c0_i32, %c0_i32_0 : i32, i32, i32
  }
}

</mosaic_0001>

<bundles_post_ra>
// kernel: tpu_custom_call.1
= control target key start
LH: loop header
LB: loop body
LE: loop exit
PB: predicated region body
PF: predicated region fallthrough
CT: control target
= control target key end

     0   :  { %17 = vsyncpa [#allocation7], 0  ;;  %s2099_s0 = inlined_call_operand.vmem [shape: f32[2,8,32], index: 0, kind: input, shape index: {}]   ;;  %s2100_s1 = inlined_call_operand.vmem [shape: f32[1,32], index: 1, kind: input, shape index: {}]   ;;  %s2101_s2 = inlined_call_operand.vmem [shape: f32[1,32], index: 2, kind: input, shape index: {}]   ;;  %s2102_s3 = inlined_call_operand.vmem [shape: bf16[32,96], index: 3, kind: input, shape index: {}]   ;;  %s2103_s4 = inlined_call_operand.vmem [shape: bf16[32,32], index: 4, kind: input, shape index: {}]   ;;  %s2104_s5 = inlined_call_operand.vmem [shape: f32[1,32], index: 5, kind: input, shape index: {}]   ;;  %s2105_s6 = inlined_call_operand.vmem [shape: f32[1,32], index: 6, kind: input, shape index: {}]   ;;  %s2106_s7 = inlined_call_operand.vmem [shape: f32[1,32], index: 7, kind: input, shape index: {}]   ;;  %s2107_s8 = inlined_call_operand.hbm [shape: bf16[32,64], index: 8, kind: input, shape index: {}]   ;;  %s2108_s9 = inlined_call_operand.vmem [shape: f32[1,64], index: 9, kind: input, shape index: {}]   ;;  %s2109_s10 = inlined_call_operand.vmem [shape: bf16[64,32], index: 10, kind: input, shape index: {}]   ;;  %s2110_s11 = inlined_call_operand.vmem [shape: f32[1,32], index: 11, kind: input, shape index: {}]   ;;  %s2111_s12 = inlined_call_operand.hbm [shape: f32[2,8,32], index: 12, kind: output, shape index: {}]  }
   0x1   :  { %18 = vsyncpa [#allocation8], 0 }
   0x2   :  { %20 = vsyncpa [#allocation8 + $0x1], 0  ;;  %s1808_s21 = smov 0   ;;  %s1810_s22 = smov 0  }
   0x3   :  { %s1812_s23 = smov 0   ;;  %s1814_s24 = smov 0  }
   0x4 LB: > { %2116 = sst [smem:[#allocation12_spill]] %s1717_s23  ;;  %s1829_s25 = sadd.s32 4294967295, %s1721_s24   ;;  %s1721_s24 = sphi %s1814_s24, %s2131_s24   ;;  %s1717_s23 = sphi %s1812_s23, %s2128_s23   ;;  %s1713_s22 = sphi %s1810_s22, %s2130_s22   ;;  %s1709_s21 = sphi %s1808_s21, %s2129_s21  }
   0x5   : > { %s1370_s26 = sadd.s32 4294967294, %s1721_s24   ;;  %s1833_s27 = sadd.s32 1, %s1721_s24  }
   0x6   : > { %s290_s28 = sadd.s32 1, %s1717_s23  ;;  %s287_s29 = ssub.s32 %s1721_s24, %s1833_s27 }
   0x7   : > { %p300_p0 = scmp.ne.s32.totalorder %s1717_s23, %s1713_s22  ;;  %p288_p1 = scmp.eq.s32.totalorder %s287_s29, 0 }
   0x8   : > { %p301_p2 = scmp.eq.s32.totalorder %s1829_s25, 1  ;;  %p306_p3 = scmp.ne.s32.totalorder %s1713_s22, %s1709_s21 }
   0x9   : > { %p307_p4 = scmp.eq.s32.totalorder %s1370_s26, 1  ;;  %p1371_p7 = scmp.ge.s32.totalorder %s1721_s24, 1 }
   0xa   : > { %s1844_s30 = scalar_select %p288_p1, %s1717_s23, %s290_s28  }
   0xb   : > { %p1846_p5 = por %p301_p2, %p300_p0  ;;  %p1850_p6 = por %p307_p4, %p306_p3 }
   0xc   : > { %2117 = sst [smem:[#allocation13_spill]] %s1844_s30  ;;  %p314_p8 = scmp.lt.s32.totalorder %s1721_s24, 3 }
   0xd   : > { %s2118_s13 = scalar_select %p1846_p5, 1, 0 }
   0xe   : > { %s2119_s14 = scalar_select %p1850_p6, 1, 0 }
   0xf   : > { %p2113_p9 = scmp.eq.s32.totalorder %s1829_s25, 0  ;;  %p1857_p10 = pnand %p1371_p7, %p314_p8 }
  0x10   : > { %s1723_s16 = smov [#allocation6]   ;;  %s1627_s26 = scalar_lea.hbm %s2107_s8, 256 }
  0x11   : > { %s2120_s15 = scalar_select %p1857_p10, 1, 0 }
  0x12   : > { %s347_s17 = sshll.u32 %s1723_s16, 4  ;;  %p1533_p11 = pneg %p1857_p10  ;;  %s348_s17 = int_to_ptr.vmem [resolvable:$true] %s347_s17 }
  0x13   : > { %p1628_p13 = scmp.ne.s32.totalorder %s2107_s8, %s1627_s26  ;;  %p1634_p3 = scmp.lt.u32.totalorder %s1627_s26, %s2107_s8 }
  0x14   : > { %p1865_p12 = pnand %p2113_p9, %p1533_p11 }
  0x16   : > { %p1629_p0 = pneg %p1865_p12 }
  0x18   : > { %p1630_p1 = pnand %p1629_p0, %p1628_p13 }
  0x1a   : > { %p1631_p2 = pneg %p1630_p1 }
  0x1c   : > { %p1636_p4 = pnand %p1634_p3, %p1631_p2 }
  0x1e   : > { %1639 = shalt.err (!%p1636_p4)
}
  0x1f   : > { %s1640_s23 = scalar_lea.vmem %s348_s17, 256  ;;  %p1648_p9 = scmp.lt.s32.totalorder %s348_s17, %s348_s17 }
  0x20   : > { %p1641_p7 = scmp.ne.s32.totalorder %s348_s17, %s1640_s23  ;;  %p1649_p6 = scmp.lt.s32.totalorder %s1640_s23, %s1640_s23 }
  0x22   : > { %p1643_p8 = pnand %p1641_p7, %p1629_p0  ;;  %p1650_p5 = por %p1649_p6, %p1648_p9 }
  0x24   : > { %p1644_p11 = pneg %p1643_p8 }
  0x26   : > { %p1651_p10 = pnand %p1650_p5, %p1644_p11 }
  0x28   : > { %1654 = shalt.err (!%p1651_p10)
}
  0x29   : > { %s1724_s19 = smov 64   ;;  %s1725_s20 = smov 4  }
  0x2a   : > { %1536 = dma.hbm_to_vmem [thread:$0]  (!%p1865_p12), %s2107_s8, 256, %s348_s17, [#allocation7], %s1724_s19, %s1724_s19, %s1725_s20  }
  0x2b   : > { %p2122_p13 = scmp.ne.s32.totalorder %s2120_s15, 0 }
  0x2c   : > { %p2123_p1 = scmp.eq.s32.totalorder (!%p2122_p13), %s1829_s25, 0 }
  0x2d   : > { %379 = sbr.rel (%p2122_p13) target bundleno = 2610 (0xa32), region = 68 }
  0x34   : > { %1700 = dma.done.wait (%p2123_p1), [#allocation7], 256   ;;  %p2124_p0 = pmov %p2123_p1 }
  0x35   : > { %p420_p5 = scmp.lt.s32.totalorder %s1829_s25, 1  ;;  %vm428_vm0 = vcmask 261120   ;;  %v1595_v7 = vld [vmem:[%s2102_s3] sm:$0xff]   ;;  %v1726_v8 = vmov 0.0   ;;  %vm1727_vm1 = vmmov 0   ;;  %v1596_v9 = vld [vmem:[%s2102_s3 + $0x8] sm:$0xff]  }
  0x36   : > { %1702 = vsyncadd (%p2124_p0), [#allocation7], 4294967040  ;;  %1443 = vmatprep.subr.bf16.mxu0 %v1726_v8  ;;  %1447 = vmatprep.mubr.msk.bf16.mxu0 %vm1727_vm1, %v1726_v8  ;;  %v1378_v14 = vld [vmem:[%s2100_s1] ss:$0 sm:$0xff]  ;;  %vm518_vm2 = vcmask 60416   ;;  %s1728_s26 = smov 80  }
  0x37   : > { %s421_s23 = scalar_select %p420_p5, %s1829_s25, 1  ;;  %1444 = vmatpush3.bf16.msra.mxu0 %v1595_v7  ;;  %1451 = vmatprep.subr.bf16.mxu1 %v1726_v8  ;;  %v1379_v16 = vld [vmem:[%s2101_s2] ss:$0 sm:$0xff]  ;;  %vm584_vm3 = vcmask 64512   ;;  %vm824_vm4 = vcmask 1043456   ;;  %vm1011_vm5 = vcmask 130112  }
  0x38   : > { %1445 = vmatprep.subr.bf16.mxu0 %v1726_v8  ;;  %1453 = vmatprep.mubr.msk.bf16.mxu1 %vm1727_vm1, %v1726_v8  ;;  %s1729_s18 = smov 96   ;;  %s1731_s15 = smov 120   ;;  %vm1017_vm6 = vcmask 195712   ;;  %vm1023_vm7 = vcmask 261312   ;;  %vm1239_vm8 = vcmask 523264  }
  0x39   : > { %s1377_s30 = sshll.u32 %s421_s23, 3  ;;  %s1732_s17 = smov 72  }
  0x3a   : > { %s423_s16 = scalar_lea.vmem %s2099_s0, %s1377_s30  ;;  %s1733_s19 = smov 112  }
  0x3b   : > { %v1896_v0 = vld [vmem:[%s423_s16] sm:$0xff]  ;;  %1446 = vmatpush3.bf16.msra.mxu0 %v1596_v9  ;;  %s1730_s16 = smov 88   ;;  %s1734_s20 = smov 104  }
  0x3c   : > { %v429_v1 = vsel %vm428_vm0, %v1896_v0, 0.0  ;;  %1457 = vmatprep.subr.bf16.mxu0 %v1726_v8  ;;  %s1735_s28 = smov 64   ;;  %s1736_s29 = smov 48  }
  0x3d   : > { %430 = vadd.xlane.f32.xlu0 %v429_v1  ;;  %s1737_s23 = smov 40   ;;  %s1738_s30 = smov 56  }
  0x3e   : > { %p2125_p9 = scmp.ne.s32.totalorder %s2118_s13, 0 }
  0xca   : > { %v431_v2 = vpop.xlane.xlu0 %430 }
  0xcb   : > { %v433_v3 = vmul.f32 0.03125, %v431_v2 }
  0xcd   : > { %v434_v4 = vsub.f32 %v1896_v0, %v433_v3 }
  0xcf   : > { %v435_v5 = vmul.f32 %v434_v4, %v434_v4 }
  0xd1   : > { %v436_v6 = vsel %vm428_vm0, %v435_v5, 0.0 }
  0xd2   : > { %437 = vadd.xlane.f32.xlu0 %v436_v6 }
 0x15f   : > { %v438_v10 = vpop.xlane.xlu0 %437 }
 0x160   : > { %v439_v11 = vmul.f32 0.03125, %v438_v10 }
 0x162   : > { %v440_v12 = vadd.f32 1e-05, %v439_v11 }
 0x164   : > { %1605 = vrsqrt.f32 %v440_v12 }
 0x16e   : > { %v1606_v13 = vpop.eup %1605 }
 0x16f   : > { %v442_v15 = vmul.f32 %v1606_v13, %v434_v4 }
 0x171   : > { %v449_v17 = vmul.f32 %v1378_v14, %v442_v15 }
 0x173   : > { %v456_v18 = vadd.f32 %v1379_v16, %v449_v17 }
 0x175   : > { %v461_v19 = vpack.c.bf16 %v456_v18, %v456_v18 }
 0x177   : > { %1448 = vmatmul.mubr.msk.bf16.vlgmr.msra.gmra.mrb[0].mxu0 %vm428_vm0, %v461_v19 }
 0x178   : > { %1459 = vmatprep.mubr.msk.bf16.mxu0 %vm1727_vm1, %v1726_v8 }
 0x24a   : > { %v511_v20 = vpop.f32.mrb[0].mxu0 }
 0x24b   : > { %v1925_v21 = vpack.c.bf16 %v511_v20, %v511_v20  ;;  %v1449_v22 = vpop.f32.mrb[1].mxu0 }
 0x24c   : > { %v514_v23 = vpop.f32.mrb[2].mxu0 }
 0x24d   : > { %551 = vrot.lane.b32.xlu0 %v1925_v21, %s1728_s26  ;;  %523 = vrot.lane.b32.xlu1 %v1925_v21, %s1729_s18  ;;  %v1450_v24 = vpop.f32.mrb[3].mxu0  ;;  %519 = vst.msk [vmem:[#allocation2] sm:$0xf] %vm518_vm2, %v1925_v21  ;;  %s417_s18 = sand.u32 1, %s1713_s22  }
 0x251   : > { %536 = vrot.lane.b32.xlu1 %v1925_v21, %s1730_s16  ;;  %s1739_s16 = smov 16  }
 0x254   : > { %v576_v36 = vld [vmem:[#allocation2] sm:$0xf] }
 0x255   : > { %531 = vrot.lane.b32.xlu1 %v1925_v21, %s1731_s15 }
 0x259   : > { %566 = vrot.lane.b32.xlu1 %v1925_v21, %s1732_s17 }
 0x25d   : > { %546 = vrot.lane.b32.xlu1 %v1925_v21, %s1733_s19  ;;  %s1740_s19 = smov 8  }
 0x261   : > { %561 = vrot.lane.b32.xlu1 %v1925_v21, %s1734_s20  ;;  %s1741_s20 = smov 24  }
 0x2bf   : > { %v552_v25 = vpop.permute.xlu0 %551  ;;  %v524_v26 = vpop.permute.xlu1 %523 }
 0x2c0   : > { %555 = vst.msk [vmem:[#allocation3 + $0x8] sm:$0xf] %vm518_vm2, %v552_v25  ;;  %526 = vst.msk [vmem:[#allocation3] sm:$0xf] %vm518_vm2, %v524_v26 }
 0x2c3   : > { %v537_v27 = vpop.permute.xlu1 %536 }
 0x2c4   : > { %540 = vst.msk [vmem:[#allocation3 + $0x4] sm:$0xf] %vm518_vm2, %v537_v27 }
 0x2c7   : > { %v532_v28 = vpop.permute.xlu1 %531  ;;  %v580_v29 = vld [vmem:[#allocation3] sm:$0xf]  ;;  %v582_v34 = vld [vmem:[#allocation3 + $0x8] sm:$0xf] }
 0x2c8   : > { %535 = vst.msk [vmem:[#allocation2 + $0x4] sm:$0xf] %vm518_vm2, %v532_v28  ;;  %v589_v30 = vsel %vm584_vm3, %v580_v29, 0  ;;  %v681_v37 = vsel %vm584_vm3, %v582_v34, 0 }
 0x2c9   : > { %1452 = vmatpush3.bf16.xpose.msra.mxu1 %v589_v30 }
 0x2ca   : > { %1463 = vmatprep.subr.bf16.mxu1 %v1726_v8 }
 0x2cb   : > { %v567_v31 = vpop.permute.xlu1 %566  ;;  %v581_v32 = vld [vmem:[#allocation3 + $0x4] sm:$0xf] }
 0x2cc   : > { %570 = vst.msk [vmem:[#allocation3 + $0xc] sm:$0xf] %vm518_vm2, %v567_v31  ;;  %v635_v33 = vsel %vm584_vm3, %v581_v32, 0 }
 0x2cd   : > { %1458 = vmatpush3.bf16.xpose.msra.mxu0 %v635_v33 }
 0x2ce   : > { %1469 = vmatprep.subr.bf16.mxu0 %v1726_v8 }
 0x2cf   : > { %v547_v35 = vpop.permute.xlu1 %546  ;;  %v577_v39 = vld [vmem:[#allocation2 + $0x4] sm:$0xf] }
 0x2d0   : > { %550 = vst.msk [vmem:[#allocation2 + $0x8] sm:$0xf] %vm518_vm2, %v547_v35  ;;  %1454 = vmatmul.mubr.msk.bf16.vlgmr.msra.gmra.mrb[0].mxu1 %vm584_vm3, %v576_v36 }
 0x2d1   : > { %1464 = vmatpush3.bf16.xpose.msra.mxu1 %v681_v37  ;;  %1465 = vmatprep.mubr.msk.bf16.mxu1 %vm1727_vm1, %v1726_v8 }
 0x2d2   : > { %1475 = vmatprep.subr.bf16.mxu1 %v1726_v8 }
 0x2d3   : > { %v562_v38 = vpop.permute.xlu1 %561  ;;  %v583_v40 = vld [vmem:[#allocation3 + $0xc] sm:$0xf] }
 0x2d4   : > { %565 = vst.msk [vmem:[#allocation2 + $0xc] sm:$0xf] %vm518_vm2, %v562_v38  ;;  %1460 = vmatmul.mubr.msk.bf16.vlgmr.msra.gmra.mrb[4].mxu0 %vm584_vm3, %v577_v39  ;;  %v727_v41 = vsel %vm584_vm3, %v583_v40, 0 }
 0x2d5   : > { %1470 = vmatpush3.bf16.xpose.msra.mxu0 %v727_v41  ;;  %1471 = vmatprep.mubr.msk.bf16.mxu0 %vm1727_vm1, %v1726_v8 }
 0x2d6   : > { %1481 = vmatprep.subr.bf16.mxu0 %v1726_v8 }
 0x2d7   : > { %v578_v42 = vld [vmem:[#allocation2 + $0x8] sm:$0xf] }
 0x2d8   : > { %1466 = vmatmul.mubr.msk.bf16.vlgmr.msra.gmra.mrb[4].mxu1 %vm584_vm3, %v578_v42 }
 0x2d9   : > { %1477 = vmatprep.mubr.msk.bf16.mxu1 %vm1727_vm1, %v1726_v8 }
 0x2db   : > { %v579_v43 = vld [vmem:[#allocation2 + $0xc] sm:$0xf] }
 0x2dc   : > { %1472 = vmatmul.mubr.msk.bf16.vlgmr.msra.gmra.mrb[8].mxu0 %vm584_vm3, %v579_v43 }
 0x2dd   : > { %1483 = vmatprep.mubr.msk.bf16.mxu0 %vm1727_vm1, %v1726_v8 }
 0x3a3   : > { %v625_v44 = vpop.f32.mrb[0].mxu1 }
 0x3a4   : > { %v1455_v45 = vpop.f32.mrb[1].mxu1  ;;  %v769_v46 = vsel %vm584_vm3, %v625_v44, -inf }
 0x3a5   : > { %770 = vmax.xlane.f32.xlu1 %v769_v46  ;;  %v628_v47 = vpop.f32.mrb[2].mxu1 }
 0x3a6   : > { %v1456_v48 = vpop.f32.mrb[3].mxu1 }
 0x3a7   : > { %v671_v49 = vpop.f32.mrb[4].mxu0 }
 0x3a8   : > { %v1461_v50 = vpop.f32.mrb[5].mxu0  ;;  %v772_v51 = vsel %vm584_vm3, %v671_v49, -inf }
 0x3a9   : > { %773 = vmax.xlane.f32.xlu0 %v772_v51  ;;  %v674_v52 = vpop.f32.mrb[6].mxu0 }
 0x3aa   : > { %v1462_v53 = vpop.f32.mrb[7].mxu0 }
 0x3ab   : > { %v717_v54 = vpop.f32.mrb[4].mxu1 }
 0x3ac   : > { %v1467_v55 = vpop.f32.mrb[5].mxu1  ;;  %v775_v56 = vsel %vm584_vm3, %v717_v54, -inf }
 0x3ad   : > { %776 = vmax.xlane.f32.xlu1 %v775_v56  ;;  %v720_v57 = vpop.f32.mrb[6].mxu1  ;;  %v1597_v55 = vld [vmem:[%s2103_s4] sm:$0xff]  }
 0x3ae   : > { %v1468_v58 = vpop.f32.mrb[7].mxu1 }
 0x3af   : > { %v763_v59 = vpop.f32.mrb[8].mxu0  ;;  %v1598_v58 = vld [vmem:[%s2103_s4 + $0x8] sm:$0xff]  }
 0x3b0   : > { %v1473_v60 = vpop.f32.mrb[9].mxu0  ;;  %v778_v61 = vsel %vm584_vm3, %v763_v59, -inf }
 0x3b1   : > { %779 = vmax.xlane.f32.xlu0 %v778_v61  ;;  %v766_v62 = vpop.f32.mrb[10].mxu0 }
 0x3b2   : > { %v1474_v63 = vpop.f32.mrb[11].mxu0 }
 0x3be   : > { %527 = vrot.lane.b32.xlu1 %v1925_v21, %s1735_s28 }
 0x432   : > { %v771_v1 = vpop.xlane.xlu1 %770 }
 0x433   : > { %v781_v2 = vsub.f32 %v625_v44, %v771_v1 }
 0x435   : > { %v785_v3 = vmul.f32 1.442695, %v781_v2 }
 0x436   : > { %v774_v4 = vpop.xlane.xlu0 %773 }
 0x437   : > { %1607 = vpow2.f32 %v785_v3  ;;  %v782_v5 = vsub.f32 %v671_v49, %v774_v4 }
 0x439   : > { %v787_v6 = vmul.f32 1.442695, %v782_v5 }
 0x43a   : > { %v777_v7 = vpop.xlane.xlu1 %776 }
 0x43b   : > { %1609 = vpow2.f32 %v787_v6  ;;  %v783_v9 = vsub.f32 %v717_v54, %v777_v7 }
 0x43d   : > { %v789_v10 = vmul.f32 1.442695, %v783_v9 }
 0x43e   : > { %v528_v11 = vpop.permute.xlu1 %527  ;;  %v780_v12 = vpop.xlane.xlu0 %779 }
 0x43f   : > { %1611 = vpow2.f32 %v789_v10  ;;  %530 = vst.msk [vmem:[#allocation4] sm:$0xf] %vm518_vm2, %v528_v11  ;;  %v784_v13 = vsub.f32 %v763_v59, %v780_v12  ;;  %v1392_v11 = vld [vmem:[%s2104_s5] ss:$0 sm:$0xff] }
 0x441   : > { %v1608_v14 = vpop.eup %1607  ;;  %v791_v15 = vmul.f32 1.442695, %v784_v13 }
 0x442   : > { %v793_v16 = vsel %vm584_vm3, %v1608_v14, 0.0 }
 0x443   : > { %1613 = vpow2.f32 %v791_v15  ;;  %794 = vadd.xlane.f32.xlu1 %v793_v16 }
 0x445   : > { %v1610_v17 = vpop.eup %1609 }
 0x446   : > { %v796_v18 = vsel %vm584_vm3, %v1610_v17, 0.0  ;;  %v817_v19 = vld [vmem:[#allocation4] sm:$0xf] }
 0x447   : > { %797 = vadd.xlane.f32.xlu0 %v796_v18  ;;  %v826_v20 = vsel %vm824_vm4, %v817_v19, 0 }
 0x448   : > { %1476 = vmatpush3.bf16.msra.mxu1 %v826_v20 }
 0x449   : > { %v1612_v22 = vpop.eup %1611  ;;  %1487 = vmatprep.subr.bf16.mxu1 %v1726_v8 }
 0x44a   : > { %v799_v23 = vsel %vm584_vm3, %v1612_v22, 0.0 }
 0x44b   : > { %800 = vadd.xlane.f32.xlu1 %v799_v23 }
 0x44d   : > { %v1614_v24 = vpop.eup %1613 }
 0x44e   : > { %v802_v25 = vsel %vm584_vm3, %v1614_v24, 0.0 }
 0x44f   : > { %803 = vadd.xlane.f32.xlu0 %v802_v25  ;;  %v1599_v25 = vld [vmem:[#allocation6] sm:$0xff]  }
 0x45c   : > { %556 = vrot.lane.b32.xlu1 %v1925_v21, %s1736_s29 }
 0x460   : > { %571 = vrot.lane.b32.xlu1 %v1925_v21, %s1737_s23 }
 0x465   : > { %541 = vrot.lane.b32.xlu0 %v1925_v21, %s1738_s30 }
 0x4d0   : > { %v795_v26 = vpop.xlane.xlu1 %794 }
 0x4d1   : > { %1615 = vrcp.f32 %v795_v26  ;;  %v1600_v26 = vld [vmem:[#allocation6 + $0x8] sm:$0xff]  }
 0x4d4   : > { %v798_v27 = vpop.xlane.xlu0 %797 }
 0x4d8   : > { %v801_v28 = vpop.xlane.xlu1 %800 }
 0x4d9   : > { %1617 = vrcp.f32 %v801_v28 }
 0x4da   : > { %1619 = vrcp.f32 %v798_v27 }
 0x4db   : > { %v1616_v29 = vpop.eup %1615 }
 0x4dc   : > { %v809_v30 = vmul.f32 %v1616_v29, %v1608_v14  ;;  %v557_v31 = vpop.permute.xlu1 %556  ;;  %v804_v32 = vpop.xlane.xlu0 %803 }
 0x4dd   : > { %560 = vst.msk [vmem:[#allocation4 + $0x8] sm:$0xf] %vm518_vm2, %v557_v31  ;;  %1621 = vrcp.f32 %v804_v32  ;;  %v1397_v32 = vld [vmem:[%s2106_s7] ss:$0 sm:$0xff] }
 0x4de   : > { %v813_v33 = vpack.c.bf16 %v809_v30, %v809_v30  ;;  %v1396_v30 = vld [vmem:[%s2105_s6] ss:$0 sm:$0xff] }
 0x4e0   : > { %1478 = vmatmul.mubr.msk.bf16.vlgmr.msra.gmra.mrb[8].mxu1 %vm584_vm3, %v813_v33  ;;  %v572_v34 = vpop.permute.xlu1 %571  ;;  %v542_v35 = vpop.permute.xlu0 %541 }
 0x4e1   : > { %575 = vst.msk [vmem:[#allocation4 + $0xc] sm:$0xf] %vm518_vm2, %v572_v34  ;;  %545 = vst.msk [vmem:[#allocation4 + $0x4] sm:$0xf] %vm518_vm2, %v542_v35  ;;  %1489 = vmatprep.mubr.msk.bf16.mxu1 %vm1727_vm1, %v1726_v8 }
 0x4e3   : > { %v1618_v21 = vpop.eup %1617 }
 0x4e4   : > { %v1620_v36 = vpop.eup %1619  ;;  %v811_v37 = vmul.f32 %v1618_v21, %v1612_v22  ;;  %v819_v38 = vld [vmem:[#allocation4 + $0x8] sm:$0xf]  ;;  %v1601_v21 = vld [vmem:[%s2109_s10] sm:$0xff]  }
 0x4e5   : > { %v918_v39 = vsel %vm824_vm4, %v819_v38, 0  ;;  %v810_v41 = vmul.f32 %v1620_v36, %v1610_v17  ;;  %v1602_v36 = vld [vmem:[%s2109_s10 + $0x8] sm:$0xff]   ;;  %v1604_v38 = vld [vmem:[%s2109_s10 + $0x18] sm:$0xff]  }
 0x4e6   : > { %1488 = vmatpush3.bf16.msra.mxu1 %v918_v39  ;;  %v815_v40 = vpack.c.bf16 %v811_v37, %v811_v37  ;;  %v1603_v37 = vld [vmem:[%s2109_s10 + $0x10] sm:$0xff]   ;;  %v1398_v39 = vld [vmem:[%s2108_s9] ss:$0 sm:$0xff] }
 0x4e7   : > { %1499 = vmatprep.subr.bf16.mxu1 %v1726_v8  ;;  %v814_v45 = vpack.c.bf16 %v810_v41, %v810_v41  ;;  %v1622_v46 = vpop.eup %1621 }
 0x4e8   : > { %v818_v42 = vld [vmem:[#allocation4 + $0x4] sm:$0xf]  ;;  %v820_v44 = vld [vmem:[#allocation4 + $0xc] sm:$0xf]  ;;  %v812_v48 = vmul.f32 %v1622_v46, %v1614_v24 }
 0x4e9   : > { %1490 = vmatmul.mubr.msk.bf16.vlgmr.msra.gmra.mrb[12].mxu1 %vm584_vm3, %v815_v40  ;;  %v872_v43 = vsel %vm824_vm4, %v818_v42, 0  ;;  %v964_v47 = vsel %vm824_vm4, %v820_v44, 0 }
 0x4ea   : > { %1482 = vmatpush3.bf16.msra.mxu0 %v872_v43  ;;  %1503 = vmatprep.mubr.msk.bf16.mxu1 %vm1727_vm1, %v1726_v8  ;;  %v816_v49 = vpack.c.bf16 %v812_v48, %v812_v48 }
 0x4eb   : > { %1493 = vmatprep.subr.bf16.mxu0 %v1726_v8  ;;  %1500 = vmatpush3.bf16.msra.mxu1 %v1597_v55 }
 0x4ec   : > { %1501 = vmatprep.subr.bf16.mxu1 %v1726_v8 }
 0x4ed   : > { %1484 = vmatmul.mubr.msk.bf16.vlgmr.msra.gmra.mrb[12].mxu0 %vm584_vm3, %v814_v45 }
 0x4ee   : > { %1494 = vmatpush3.bf16.msra.mxu0 %v964_v47  ;;  %1495 = vmatprep.mubr.msk.bf16.mxu0 %vm1727_vm1, %v1726_v8 }
 0x4ef   : > { %1507 = vmatprep.subr.bf16.mxu0 %v1726_v8  ;;  %1502 = vmatpush3.bf16.msra.mxu1 %v1598_v58 }
 0x4f0   : > { %1515 = vmatprep.subr.bf16.mxu1 %v1726_v8 }
 0x4f5   : > { %1496 = vmatmul.mubr.msk.bf16.vlgmr.msra.gmra.mrb[16].mxu0 %vm584_vm3, %v816_v49 }
 0x4f6   : > { %1511 = vmatprep.mubr.msk.bf16.mxu0 %vm1727_vm1, %v1726_v8  ;;  %1508 = vmatpush3.bf16.msra.mxu0 %v1599_v25 }
 0x4f7   : > { %1509 = vmatprep.subr.bf16.mxu0 %v1726_v8 }
 0x4fa   : > { %1510 = vmatpush3.bf16.msra.mxu0 %v1600_v26 }
 0x5b3   : > { %v862_v50 = vpop.f32.mrb[8].mxu1 }
 0x5b4   : > { %1006 = vst.msk [vmem:[#allocation5] sm:$0xff] %vm584_vm3, %v862_v50  ;;  %v1479_v51 = vpop.f32.mrb[9].mxu1 }
 0x5b5   : > { %v865_v52 = vpop.f32.mrb[10].mxu1 }
 0x5b6   : > { %v1480_v53 = vpop.f32.mrb[11].mxu1 }
 0x5bc   : > { %v954_v54 = vpop.f32.mrb[12].mxu1 }
 0x5bd   : > { %1014 = vrot.lane.b32.xlu1 %v954_v54, %s1739_s16  ;;  %v1491_v56 = vpop.f32.mrb[13].mxu1  ;;  %s1376_s16 = sshll.u32 %s417_s18, 3  ;;  %v1402_v54 = vld [vmem:[%s2110_s11] ss:$0 sm:$0xff] }
 0x5be   : > { %v957_v57 = vpop.f32.mrb[14].mxu1 }
 0x5bf   : > { %v1492_v59 = vpop.f32.mrb[15].mxu1 }
 0x5c0   : > { %v908_v60 = vpop.f32.mrb[12].mxu0 }
 0x5c1   : > { %1008 = vrot.lane.b32.xlu0 %v908_v60, %s1740_s19  ;;  %v1485_v61 = vpop.f32.mrb[13].mxu0  ;;  %s1409_s19 = sshll.u32 %s1829_s25, 7  ;;  %s1286_s25 = scalar_lea.sflag [#allocation8], %s417_s18 }
 0x5c2   : > { %v911_v62 = vpop.f32.mrb[14].mxu0  ;;  %s2056_s30 = scalar_lea.hbm %s2111_s12, %s1409_s19 }
 0x5c3   : > { %v1486_v63 = vpop.f32.mrb[15].mxu0 }
 0x5c8   : > { %v1000_v1 = vpop.f32.mrb[16].mxu0 }
 0x5c9   : > { %1020 = vrot.lane.b32.xlu0 %v1000_v1, %s1741_s20  ;;  %v1497_v2 = vpop.f32.mrb[17].mxu0  ;;  %s419_s20 = scalar_lea.vmem [#allocation9], %s1376_s16  ;;  %s1742_s16 = smov [#allocation9]  }
 0x5ca   : > { %v1003_v3 = vpop.f32.mrb[18].mxu0  ;;  %s1299_s28 = sshll.u32 %s419_s20, 4  ;;  %s1659_s15 = sshll.u32 %s1742_s16, 4  ;;  %s2058_s28 = int_to_ptr.vmem [resolvable:$true] %s1299_s28  ;;  %s1660_s15 = int_to_ptr.vmem [resolvable:$false] %s1659_s15 }
 0x5cb   : > { %v1498_v4 = vpop.f32.mrb[19].mxu0  ;;  %s1655_s26 = scalar_lea.vmem %s2058_s28, 128  ;;  %s1661_s17 = scalar_lea.vmem %s1660_s15, 256 }
 0x5cc   : > { %p1656_p6 = scmp.ne.s32.totalorder %s2058_s28, %s1655_s26  ;;  %p1662_p2 = scmp.lt.s32.totalorder %s2058_s28, %s1660_s15 }
 0x5cd   : > { %p1663_p3 = scmp.lt.s32.totalorder %s1661_s17, %s1655_s26 }
 0x5ce   : > { %p1657_p10 = pnand %p1656_p6, %p2125_p9 }
 0x5cf   : > { %p1664_p4 = por %p1663_p3, %p1662_p2 }
 0x5d0   : > { %p1658_p12 = pneg %p1657_p10 }
 0x5d2   : > { %p1665_p7 = pnand %p1664_p4, %p1658_p12 }
 0x62f   : > { %v1015_v6 = vpop.permute.xlu1 %1014 }
 0x633   : > { %v1009_v5 = vpop.permute.xlu0 %1008 }
 0x634   : > { %1012 = vst.msk [vmem:[#allocation5] sm:$0xff] %vm1011_vm5, %v1009_v5 }
 0x635   : > { %1018 = vst.msk [vmem:[#allocation5] sm:$0xff] %vm1017_vm6, %v1015_v6 }
 0x63b   : > { %v1021_v7 = vpop.permute.xlu0 %1020 }
 0x63c   : > { %1024 = vst.msk [vmem:[#allocation5] sm:$0xff] %vm1023_vm7, %v1021_v7 }
 0x643   : > { %v1025_v9 = vld [vmem:[#allocation5] sm:$0xff] }
 0x644   : > { %v1030_v10 = vpack.c.bf16 %v1025_v9, %v1025_v9 }
 0x646   : > { %1504 = vmatmul.mubr.msk.bf16.vlgmr.msra.gmra.mrb[16].mxu1 %vm428_vm0, %v1030_v10 }
 0x647   : > { %1523 = vmatprep.mubr.msk.bf16.mxu1 %vm1727_vm1, %v1726_v8  ;;  %1516 = vmatpush3.bf16.msra.mxu1 %v1601_v21 }
 0x648   : > { %1517 = vmatprep.subr.bf16.mxu1 %v1726_v8 }
 0x64b   : > { %1518 = vmatpush3.bf16.msra.mxu1 %v1602_v36 }
 0x64c   : > { %1519 = vmatprep.subr.bf16.mxu1 %v1726_v8 }
 0x64f   : > { %1520 = vmatpush3.bf16.msra.mxu1 %v1603_v37 }
 0x650   : > { %1521 = vmatprep.subr.bf16.mxu1 %v1726_v8 }
 0x653   : > { %1522 = vmatpush3.bf16.msra.mxu1 %v1604_v38 }
 0x719   : > { %v1087_v12 = vpop.f32.mrb[16].mxu1 }
 0x71a   : > { %v1088_v13 = vadd.f32 %v1392_v11, %v1087_v12  ;;  %v1505_v14 = vpop.f32.mrb[17].mxu1 }
 0x71b   : > { %v1090_v15 = vpop.f32.mrb[18].mxu1 }
 0x71c   : > { %v2015_v16 = vadd.f32 %v1088_v13, %v1896_v0  ;;  %v1506_v17 = vpop.f32.mrb[19].mxu1 }
 0x71e   : > { %v1096_v18 = vsel %vm428_vm0, %v2015_v16, 0.0 }
 0x71f   : > { %1097 = vadd.xlane.f32.xlu1 %v1096_v18 }
 0x7ac   : > { %v1098_v19 = vpop.xlane.xlu1 %1097 }
 0x7ad   : > { %v1099_v20 = vmul.f32 0.03125, %v1098_v19 }
 0x7af   : > { %v1100_v22 = vsub.f32 %v2015_v16, %v1099_v20 }
 0x7b1   : > { %v1101_v23 = vmul.f32 %v1100_v22, %v1100_v22 }
 0x7b3   : > { %v1102_v24 = vsel %vm428_vm0, %v1101_v23, 0.0 }
 0x7b4   : > { %1103 = vadd.xlane.f32.xlu0 %v1102_v24 }
 0x841   : > { %v1104_v0 = vpop.xlane.xlu0 %1103 }
 0x842   : > { %v1105_v27 = vmul.f32 0.03125, %v1104_v0 }
 0x844   : > { %v1106_v28 = vadd.f32 1e-05, %v1105_v27 }
 0x846   : > { %1623 = vrsqrt.f32 %v1106_v28 }
 0x850   : > { %v1624_v29 = vpop.eup %1623 }
 0x851   : > { %v1108_v31 = vmul.f32 %v1624_v29, %v1100_v22 }
 0x853   : > { %v1115_v33 = vmul.f32 %v1396_v30, %v1108_v31 }
 0x855   : > { %v1122_v34 = vadd.f32 %v1397_v32, %v1115_v33 }
 0x857   : > { %v1127_v35 = vpack.c.bf16 %v1122_v34, %v1122_v34 }
 0x859   : > { %1512 = vmatmul.mubr.msk.bf16.vlgmr.msra.gmra.mrb[20].mxu0 %vm428_vm0, %v1127_v35 }
 0x92c   : > { %v1184_v40 = vpop.f32.mrb[20].mxu0 }
 0x92d   : > { %v1185_v41 = vadd.f32 %v1398_v39, %v1184_v40  ;;  %v1513_v42 = vpop.f32.mrb[21].mxu0 }
 0x92e   : > { %v1187_v43 = vpop.f32.mrb[22].mxu0 }
 0x92f   : > { %v1190_v44 = vmul.f32 %v1185_v41, %v1185_v41  ;;  %v1514_v45 = vpop.f32.mrb[23].mxu0 }
 0x931   : > { %v1191_v46 = vmul.f32 %v1190_v44, %v1185_v41 }
 0x933   : > { %v1192_v47 = vmul.f32 0.044715, %v1191_v46 }
 0x935   : > { %v1193_v8 = vadd.f32 %v1192_v47, %v1185_v41 }
 0x937   : > { %v1194_v48 = vmul.f32 0.7978846, %v1193_v8 }
 0x939   : > { %1625 = vtanh.f32 %v1194_v48 }
 0x943   : > { %v1626_v49 = vpop.eup %1625 }
 0x944   : > { %v1196_v50 = vadd.f32 1.0, %v1626_v49 }
 0x946   : > { %v1197_v51 = vmul.f32 0.5, %v1196_v50 }
 0x948   : > { %v1198_v52 = vmul.f32 %v1197_v51, %v1185_v41 }
 0x94a   : > { %v1207_v53 = vpack.c.bf16 %v1198_v52, %v1198_v52 }
 0x94c   : > { %1524 = vmatmul.mubr.msk.bf16.vlgmr.msra.gmra.mrb[20].mxu1 %vm1239_vm8, %v1207_v53 }
 0xa1f   : > { %v1277_v55 = vpop.f32.mrb[20].mxu1 }
 0xa20   : > { %v1278_v56 = vadd.f32 %v1402_v54, %v1277_v55  ;;  %v1525_v57 = vpop.f32.mrb[21].mxu1 }
 0xa21   : > { %v1280_v58 = vpop.f32.mrb[22].mxu1 }
 0xa22   : > { %v1283_v59 = vadd.f32 %v1278_v56, %v2015_v16  ;;  %v1526_v60 = vpop.f32.mrb[23].mxu1 }
 0xa24   : > { %1284 = vst.msk [vmem:[%s419_s20] sm:$0xff] %vm428_vm0, %v1283_v59 }
 0xa25   : > { %1668 = shalt.err (!%p1665_p7)
}
 0xa26   : > { %s1669_s18 = scalar_lea.hbm %s2056_s30, 128  ;;  %s1673_s29 = scalar_lea.hbm %s2111_s12, 256 }
 0xa27   : > { %p1670_p8 = scmp.ne.s32.totalorder %s2056_s30, %s1669_s18  ;;  %p1674_p1 = scmp.lt.u32.totalorder %s2056_s30, %s2111_s12 }
 0xa28   : > { %p1675_p0 = scmp.lt.u32.totalorder %s1673_s29, %s1669_s18  ;;  %p1677_p6 = scmp.lt.u32.totalorder %s1669_s18, %s2056_s30 }
 0xa29   : > { %p1671_p11 = pnand %p1670_p8, %p2125_p9 }
 0xa2a   : > { %p1676_p5 = por %p1675_p0, %p1674_p1 }
 0xa2b   : > { %p1672_p13 = pneg %p1671_p11 }
 0xa2c   : > { %p1678_p10 = por %p1677_p6, %p1676_p5 }
 0xa2e   : > { %p1679_p12 = pnand %p1678_p10, %p1672_p13 }
 0xa30   : > { %1682 = shalt.err (!%p1679_p12)
}
 0xa31   : > { %1531 = dma.vmem_to_hbm [thread:$0]  (%p2125_p9), %s2058_s28, 128, %s2056_s30, %s1286_s25  }
 0xa32 PF: > { %p1543_p2 = scmp.ge.s32.totalorder %s1721_s24, 2  ;;  %s1311_s26 = sand.u32 1, %s1709_s21  }
 0xa33   : > { %p2126_p3 = scmp.ne.s32.totalorder %s2119_s14, 0  ;;  %s1312_s15 = scalar_lea.sflag [#allocation8], %s1311_s26 }
 0xa35   : > { %p1538_p4 = pnand %p1543_p2, %p2126_p3 }
 0xa37   : > { %1704 = dma.done.wait (!%p1538_p4), %s1312_s15, 128  }
 0xa38   : > { %1706 = vsyncadd (!%p1538_p4), %s1312_s15, 4294967168  ;;  %s2127_s17 = sld [smem:[#allocation12_spill]]  ;;  %s2128_s23 = sld [smem:[#allocation13_spill]] }
 0xa39   : > { %p23_p7 = scmp.ge.s32.totalorder %s1833_s27, 4   ;;  %s2129_s21 = smov %s1713_s22 }
 0xa3a   : > { %s2131_s24 = smov %s1833_s27 }
 0xa3b   :  { %25 = sbr.rel (!%p23_p7) target bundleno = 4 (0x4), region = 117 }
 0xa3e   : > { %s2130_s22 = smov %s2127_s17 }
 0xa42   :  { %1317 = vsyncpa [#allocation7], 1 }
 0xa43   :  { %1319 = vsyncpa [#allocation7 + $0x1], 1 }
 0xa44   :  { %1320 = vsyncpa [#allocation8], 1 }
 0xa45   :  { %1322 = vsyncpa [#allocation8 + $0x1], 1 }

</bundles_post_ra>
